<compile_context>
chip_gen: v7x
topology: tpu7x:2x2x1
jax: 0.10.0
libtpu: 0.0.40
codegen_flags: <defaults>
</compile_context>

<pallas_src>
import numpy as np
import jax
import jax.numpy as jnp
from jax.experimental import pallas as pl
from jax.experimental.pallas import tpu as pltpu


def _gather_frames_kernel(idx_ref, x_hbm, o_ref, sems):
    """Gather K temporal frames (indices from SMEM) out of HBM directly into the
    pipelined output block.

    idx_ref: (N,) int32 in SMEM (scalar prefetch)
    x_hbm:   (C, T, HW) raw HBM ref (memory_space=pl.ANY)
    o_ref:   (C, K, HW) pipelined VMEM output block (DMA destination)
    sems:    (K,) DMA semaphores, one per in-flight gather
    """
    i = pl.program_id(0)
    C, K, HW = o_ref.shape
    N = idx_ref.shape[0]
    rem = N % K  # static; nonzero -> the last grid step is a partial block

    # Build every DMA descriptor once (and do all SMEM scalar reads) before any
    # .wait(); the same descriptors are reused verbatim for start() and wait().
    copies = []
    guards = []
    for k in range(K):
        n = i * K + k
        always_valid = (rem == 0) or (k < rem)  # static per-slot
        t = idx_ref[n] if always_valid else idx_ref[jnp.minimum(n, N - 1)]
        copies.append(pltpu.make_async_copy(
            x_hbm.at[:, pl.ds(t, 1), :],   # (C, 1, HW) data-dependent HBM read
            o_ref.at[:, pl.ds(k, 1), :],   # straight into the pipelined out block
            sems.at[k],
        ))
        guards.append(None if always_valid else (n < N))

    # Issue all K gathers so they are in flight together; out-of-range tail slots
    # (only possible on the last step) are skipped entirely -- no redundant HBM
    # reads, and their output rows are clipped by the pipeline on writeback.
    for k in range(K):
        if guards[k] is None:
            copies[k].start()
        else:
            @pl.when(guards[k])
            def _start(k=k):
                copies[k].start()

    for k in range(K):
        if guards[k] is None:
            copies[k].wait()
        else:
            @pl.when(guards[k])
            def _wait(k=k):
                copies[k].wait()


_SUBLANE = {4: 8, 2: 16, 1: 32}  # dtype itemsize -> sublane tile multiple


def _device_kind() -> str:
    try:
        return jax.devices()[0].device_kind.lower()
    except Exception:
        return ""


def _vmem_capacity_bytes() -> int:
    try:
        return int(pltpu.get_tpu_info().vmem_capacity_bytes)
    except Exception:
        # Conservative fallback: v7x has the smallest per-core VMEM (64 MiB).
        return 64 * 1024 * 1024


def temporal_index_select(x: jax.Array, indices: jax.Array, *,
                          frames_per_step: int | None = None,
                          prefer_pallas: bool | None = None) -> jax.Array:
    """index_select(x, dim=1, indices) as a Pallas DMA-gather kernel.

    x: (C, T, H, W), indices: (N,) int32 -> (C, N, H, W)
    """
    C, T, H, W = x.shape
    N = int(indices.shape[0])
    HW = H * W
    itemsize = jnp.dtype(x.dtype).itemsize
    frame_bytes = C * HW * itemsize
    out_bytes = N * frame_bytes

    # Tiny gathers: pallas_call launch + DMA setup overhead dominates; a fused XLA
    # gather is strictly faster there.  Force the Pallas path with prefer_pallas.
    if prefer_pallas is None:
        prefer_pallas = out_bytes >= (1 << 20)
    if not prefer_pallas:
        return jnp.take(x, indices, axis=1)

    kind = _device_kind()
    vmem_cap = _vmem_capacity_bytes()

    # Frames gathered per grid step: more in-flight DMAs hide random-access latency
    # on v6e/v7x; v5e (~0.8 TB/s HBM) saturates with fewer.
    if frames_per_step is None:
        frames_per_step = 8 if "v5" in kind else 16

    # Cap K so the multi-buffered output block stays well under VMEM on every
    # generation, then round to the dtype sublane multiple so the (C, K, HW) out
    # block is tile-legal whenever K < N.
    sub = _SUBLANE.get(itemsize, 8)
    block_budget = max(frame_bytes, vmem_cap // 8)
    K = int(min(frames_per_step, N, max(1, block_budget // frame_bytes)))
    if K < N:
        K = (K // sub) * sub
        if K == 0:
            K = min(sub, N)
        if K >= N:
            K = N
    assert K == N or K % sub == 0, f"temporal tile K={K} violates sublane tiling"

    num_blocks = int(pl.cdiv(N, K))
    block_bytes = C * K * HW * itemsize

    x_flat = x.reshape(C, T, HW)  # lane-dense last dim (free reshape)
    # TODO(synk): for very small HW (< ~512 B contiguous rows) a frame-major
    # (T, C*HW) layout would make each gather one contiguous DMA, but with the
    # (C, T, H, W) input contract that requires a full HBM transpose first -- a net
    # loss when N << T, so it is not done here.

    # Deeper output pipelining when frames are small and there are enough steps.
    out_buffers = 3 if (frame_bytes < (512 << 10) and num_blocks >= 4) else 2
    if out_buffers > 2:
        out_spec = pl.BlockSpec((C, K, HW), lambda i, idx: (0, i, 0),
                                pipeline_mode=pl.Buffered(out_buffers))
    else:
        out_spec = pl.BlockSpec((C, K, HW), lambda i, idx: (0, i, 0))

    # v7x has two TensorCores per chip: CORE_PARALLEL actually shards grid steps
    # across them (doubling outstanding DMAs); plain PARALLEL elsewhere.
    if "v7" in kind and num_blocks > 1:
        dim_sem = (pltpu.CORE_PARALLEL,)
    else:
        dim_sem = (pltpu.PARALLEL,)

    # Generation-aware scoped-VMEM request: what the pipeline needs plus slack,
    # never more than half the chip's VMEM capacity.
    vmem_limit = int(min(vmem_cap // 2,
                         max(out_buffers * block_bytes + (2 << 20), 8 << 20)))

    cost = pl.CostEstimate(
        flops=0,
        transcendentals=0,
        bytes_accessed=2 * out_bytes,  # pure read+write bandwidth op
    )

    out_flat = pl.pallas_call(
        _gather_frames_kernel,
        out_shape=jax.ShapeDtypeStruct((C, N, HW), x.dtype),
        grid_spec=pltpu.PrefetchScalarGridSpec(
            num_scalar_prefetch=1,
            grid=(num_blocks,),
            # Input stays in HBM; frames are gathered with data-dependent DMAs.
            in_specs=[pl.BlockSpec(memory_space=pl.ANY)],
            out_specs=out_spec,
            scratch_shapes=[
                pltpu.SemaphoreType.DMA((K,)),  # one sem per in-flight gather
            ],
        ),
        compiler_params=pltpu.CompilerParams(
            dimension_semantics=dim_sem,
            vmem_limit_bytes=vmem_limit,
        ),
        cost_estimate=cost,
    )(indices, x_flat)

    return out_flat.reshape(C, N, H, W)


def _compute_indices(total_frames: int, num_segments: int,
                     frames_per_segment: int, test_mode: bool,
                     seed: int = 0) -> np.ndarray:
    """Host-side replica of the index logic in get_start_indices() (numpy glue,
    exactly as it is numpy glue in the PyTorch reference)."""
    if total_frames > frames_per_segment and total_frames > 0 and (not test_mode):
        # Temporal-segment random sampling (training path). Deterministic seed in
        # place of np.random global state -- this is a synthetic kernel.
        rng = np.random.RandomState(seed)
        lin = np.linspace(0, total_frames, num_segments + 1, dtype=int)
        indices = []
        for lo, hi in zip(lin[:-1], lin[1:]):
            # Guard degenerate empty segments (total_frames < num_segments), which
            # would raise inside np.random.choice in the PyTorch reference.
            lo = int(min(lo, total_frames - 1))
            hi = int(max(hi, lo + 1))
            sel = rng.choice(np.arange(lo, hi), frames_per_segment, replace=True)
            indices.extend(np.sort(sel))
        return np.asarray(indices, dtype=np.int32)
    # uniform_temporal_subsample path (test mode / short videos).
    num_samples = num_segments * frames_per_segment
    idx = np.linspace(0, total_frames - 1, num_samples)
    return np.clip(idx, 0, total_frames - 1).astype(np.int32)


def temporal_segment_subsample(x: jax.Array,
                               num_segments: int,
                               frames_per_segment: int,
                               temporal_dim: int = -3,
                               test_mode: bool = False,
                               seed: int = 0,
                               frames_per_step: int | None = None,
                               prefer_pallas: bool | None = None) -> jax.Array:
    """Forward pass of TemporalSegmentSubsample for a (C, T, H, W) video."""
    assert x.ndim == 4 and temporal_dim in (-3, 1), "expected (C, T, H, W) layout"
    total_frames = x.shape[1]
    indices = _compute_indices(total_frames, num_segments, frames_per_segment,
                               test_mode, seed)
    # TODO(synk): duplicate indices (replace=True sampling) are re-read from HBM; a
    # host-side dedupe + in-VMEM fan-out (unique->slot map via scalar prefetch)
    # would cut HBM reads proportionally to the duplication factor.
    return temporal_index_select(x, jnp.asarray(indices, dtype=jnp.int32),
                                 frames_per_step=frames_per_step,
                                 prefer_pallas=prefer_pallas)


if __name__ == "__main__":
    key = jax.random.PRNGKey(0)
    # Small video: C=4 channels, T=16 frames, H=W=16.
    C, T, H, W = 4, 16, 16, 16
    x = jax.random.normal(key, (C, T, H, W), dtype=jnp.float32)

    num_segments = 3
    frames_per_segment = 4          # N = 12 output frames

    # Training path (random per-segment sampling, deterministic seed). Force the
    # Pallas path with an 8-frame temporal tile so this run exercises multiple
    # grid steps, including a partial (tail-guarded) last block.
    out_train = temporal_segment_subsample(
        x, num_segments, frames_per_segment, test_mode=False, seed=0,
        frames_per_step=8, prefer_pallas=True)
    out_train = jax.block_until_ready(out_train)

    # Test-mode path (uniform temporal subsample) on the Pallas path with the
    # default (generation-aware) tiling.
    out_test = temporal_segment_subsample(
        x, num_segments, frames_per_segment, test_mode=True, prefer_pallas=True)
    out_test = jax.block_until_ready(out_test)

    # Auto path: tiny output -> fused XLA gather fallback.
    out_auto = jax.block_until_ready(temporal_segment_subsample(
        x, num_segments, frames_per_segment, test_mode=True))

    # Cross-check against a plain-JAX gather reference.
    idx_train = _compute_indices(T, num_segments, frames_per_segment,
                                 test_mode=False, seed=0)
    idx_test = _compute_indices(T, num_segments, frames_per_segment,
                                test_mode=True)
    ref_train = jnp.take(x, jnp.asarray(idx_train), axis=1)
    ref_test = jnp.take(x, jnp.asarray(idx_test), axis=1)

    assert out_train.shape == (C, num_segments * frames_per_segment, H, W)
    assert out_test.shape == (C, num_segments * frames_per_segment, H, W)
    np.testing.assert_array_equal(np.asarray(out_train), np.asarray(ref_train))
    np.testing.assert_array_equal(np.asarray(out_test), np.asarray(ref_test))
    np.testing.assert_array_equal(np.asarray(out_auto), np.asarray(ref_test))

    print("KERNEL_OK")
</pallas_src>

<mosaic_0001>
module attributes {stable_mosaic.version = 11 : i64} {
  func.func @_gather_frames_kernel(%arg0: i32, %arg1: memref<12xi32, #tpu.memory_space<smem>>, %arg2: memref<4x16x256xf32, #tpu.memory_space<any>>, %arg3: memref<4x8x256xf32, #tpu.memory_space<vmem>>, %arg4: memref<8x!tpu.dma_semaphore, #tpu.memory_space<semaphore_mem>>) attributes {dimension_semantics = [#tpu.dimension_semantics<parallel>], iteration_bounds = array<i64: 2>, scalar_prefetch = 1 : i64, scratch_operands = 1 : i64, tpu.core_type = #tpu.core_type<tc>, window_params = [{}, {transform_indices = @transform_1, window_bounds = array<i64: 4, 8, 256>}]} {
    %c8_i32 = arith.constant 8 : i32
    %0 = arith.muli %arg0, %c8_i32 : i32
    %c0_i32 = arith.constant 0 : i32
    %1 = arith.addi %0, %c0_i32 : i32
    %2 = arith.index_cast %1 : i32 to index
    %3 = memref.load %arg1[%2] : memref<12xi32, #tpu.memory_space<smem>>
    %c8_i32_0 = arith.constant 8 : i32
    %4 = arith.muli %arg0, %c8_i32_0 : i32
    %c1_i32 = arith.constant 1 : i32
    %5 = arith.addi %4, %c1_i32 : i32
    %6 = arith.index_cast %5 : i32 to index
    %7 = memref.load %arg1[%6] : memref<12xi32, #tpu.memory_space<smem>>
    %c8_i32_1 = arith.constant 8 : i32
    %8 = arith.muli %arg0, %c8_i32_1 : i32
    %c2_i32 = arith.constant 2 : i32
    %9 = arith.addi %8, %c2_i32 : i32
    %10 = arith.index_cast %9 : i32 to index
    %11 = memref.load %arg1[%10] : memref<12xi32, #tpu.memory_space<smem>>
    %c8_i32_2 = arith.constant 8 : i32
    %12 = arith.muli %arg0, %c8_i32_2 : i32
    %c3_i32 = arith.constant 3 : i32
    %13 = arith.addi %12, %c3_i32 : i32
    %14 = arith.index_cast %13 : i32 to index
    %15 = memref.load %arg1[%14] : memref<12xi32, #tpu.memory_space<smem>>
    %c8_i32_3 = arith.constant 8 : i32
    %16 = arith.muli %arg0, %c8_i32_3 : i32
    %c4_i32 = arith.constant 4 : i32
    %17 = arith.addi %16, %c4_i32 : i32
    %c11_i32 = arith.constant 11 : i32
    %18 = arith.minsi %17, %c11_i32 : i32
    %19 = arith.index_cast %18 : i32 to index
    %20 = memref.load %arg1[%19] : memref<12xi32, #tpu.memory_space<smem>>
    %c12_i32 = arith.constant 12 : i32
    %21 = arith.cmpi slt, %17, %c12_i32 : i32
    %c8_i32_4 = arith.constant 8 : i32
    %22 = arith.muli %arg0, %c8_i32_4 : i32
    %c5_i32 = arith.constant 5 : i32
    %23 = arith.addi %22, %c5_i32 : i32
    %c11_i32_5 = arith.constant 11 : i32
    %24 = arith.minsi %23, %c11_i32_5 : i32
    %25 = arith.index_cast %24 : i32 to index
    %26 = memref.load %arg1[%25] : memref<12xi32, #tpu.memory_space<smem>>
    %c12_i32_6 = arith.constant 12 : i32
    %27 = arith.cmpi slt, %23, %c12_i32_6 : i32
    %c8_i32_7 = arith.constant 8 : i32
    %28 = arith.muli %arg0, %c8_i32_7 : i32
    %c6_i32 = arith.constant 6 : i32
    %29 = arith.addi %28, %c6_i32 : i32
    %c11_i32_8 = arith.constant 11 : i32
    %30 = arith.minsi %29, %c11_i32_8 : i32
    %31 = arith.index_cast %30 : i32 to index
    %32 = memref.load %arg1[%31] : memref<12xi32, #tpu.memory_space<smem>>
    %c12_i32_9 = arith.constant 12 : i32
    %33 = arith.cmpi slt, %29, %c12_i32_9 : i32
    %c8_i32_10 = arith.constant 8 : i32
    %34 = arith.muli %arg0, %c8_i32_10 : i32
    %c7_i32 = arith.constant 7 : i32
    %35 = arith.addi %34, %c7_i32 : i32
    %c11_i32_11 = arith.constant 11 : i32
    %36 = arith.minsi %35, %c11_i32_11 : i32
    %37 = arith.index_cast %36 : i32 to index
    %38 = memref.load %arg1[%37] : memref<12xi32, #tpu.memory_space<smem>>
    %c12_i32_12 = arith.constant 12 : i32
    %39 = arith.cmpi slt, %35, %c12_i32_12 : i32
    %c0_i32_13 = arith.constant 0 : i32
    %c0_i32_14 = arith.constant 0 : i32
    %c0_i32_15 = arith.constant 0 : i32
    %40 = tpu.memref_slice %arg2[%c0_i32_14, %3, %c0_i32_15] : memref<4x16x256xf32, #tpu.memory_space<any>> -> memref<4x1x256xf32, #tpu.memory_space<any>>
    %c0_i32_16 = arith.constant 0 : i32
    %c0_i32_17 = arith.constant 0 : i32
    %c0_i32_18 = arith.constant 0 : i32
    %41 = tpu.memref_slice %arg3[%c0_i32_16, %c0_i32_17, %c0_i32_18] : memref<4x8x256xf32, #tpu.memory_space<vmem>> -> memref<4x1x256xf32, #tpu.memory_space<vmem>>
    %42 = tpu.memref_slice %arg4[%c0_i32_13] : memref<8x!tpu.dma_semaphore, #tpu.memory_space<semaphore_mem>> -> memref<1x!tpu.dma_semaphore, #tpu.memory_space<semaphore_mem>>
    %43 = tpu.memref_squeeze %42 : memref<1x!tpu.dma_semaphore, #tpu.memory_space<semaphore_mem>> -> memref<!tpu.dma_semaphore, #tpu.memory_space<semaphore_mem>>
    tpu.enqueue_dma source(%40 : memref<4x1x256xf32, #tpu.memory_space<any>>) target(%41 : memref<4x1x256xf32, #tpu.memory_space<vmem>>) target_semaphore(%43 : memref<!tpu.dma_semaphore, #tpu.memory_space<semaphore_mem>>)
    %c1_i32_19 = arith.constant 1 : i32
    %c0_i32_20 = arith.constant 0 : i32
    %c0_i32_21 = arith.constant 0 : i32
    %44 = tpu.memref_slice %arg2[%c0_i32_20, %7, %c0_i32_21] : memref<4x16x256xf32, #tpu.memory_space<any>> -> memref<4x1x256xf32, #tpu.memory_space<any>>
    %c0_i32_22 = arith.constant 0 : i32
    %c1_i32_23 = arith.constant 1 : i32
    %c0_i32_24 = arith.constant 0 : i32
    %45 = tpu.memref_slice %arg3[%c0_i32_22, %c1_i32_23, %c0_i32_24] : memref<4x8x256xf32, #tpu.memory_space<vmem>> -> memref<4x1x256xf32, #tpu.memory_space<vmem>>
    %46 = tpu.memref_slice %arg4[%c1_i32_19] : memref<8x!tpu.dma_semaphore, #tpu.memory_space<semaphore_mem>> -> memref<1x!tpu.dma_semaphore, #tpu.memory_space<semaphore_mem>>
    %47 = tpu.memref_squeeze %46 : memref<1x!tpu.dma_semaphore, #tpu.memory_space<semaphore_mem>> -> memref<!tpu.dma_semaphore, #tpu.memory_space<semaphore_mem>>
    tpu.enqueue_dma source(%44 : memref<4x1x256xf32, #tpu.memory_space<any>>) target(%45 : memref<4x1x256xf32, #tpu.memory_space<vmem>>) target_semaphore(%47 : memref<!tpu.dma_semaphore, #tpu.memory_space<semaphore_mem>>)
    %c2_i32_25 = arith.constant 2 : i32
    %c0_i32_26 = arith.constant 0 : i32
    %c0_i32_27 = arith.constant 0 : i32
    %48 = tpu.memref_slice %arg2[%c0_i32_26, %11, %c0_i32_27] : memref<4x16x256xf32, #tpu.memory_space<any>> -> memref<4x1x256xf32, #tpu.memory_space<any>>
    %c0_i32_28 = arith.constant 0 : i32
    %c2_i32_29 = arith.constant 2 : i32
    %c0_i32_30 = arith.constant 0 : i32
    %49 = tpu.memref_slice %arg3[%c0_i32_28, %c2_i32_29, %c0_i32_30] : memref<4x8x256xf32, #tpu.memory_space<vmem>> -> memref<4x1x256xf32, #tpu.memory_space<vmem>>
    %50 = tpu.memref_slice %arg4[%c2_i32_25] : memref<8x!tpu.dma_semaphore, #tpu.memory_space<semaphore_mem>> -> memref<1x!tpu.dma_semaphore, #tpu.memory_space<semaphore_mem>>
    %51 = tpu.memref_squeeze %50 : memref<1x!tpu.dma_semaphore, #tpu.memory_space<semaphore_mem>> -> memref<!tpu.dma_semaphore, #tpu.memory_space<semaphore_mem>>
    tpu.enqueue_dma source(%48 : memref<4x1x256xf32, #tpu.memory_space<any>>) target(%49 : memref<4x1x256xf32, #tpu.memory_space<vmem>>) target_semaphore(%51 : memref<!tpu.dma_semaphore, #tpu.memory_space<semaphore_mem>>)
    %c3_i32_31 = arith.constant 3 : i32
    %c0_i32_32 = arith.constant 0 : i32
    %c0_i32_33 = arith.constant 0 : i32
    %52 = tpu.memref_slice %arg2[%c0_i32_32, %15, %c0_i32_33] : memref<4x16x256xf32, #tpu.memory_space<any>> -> memref<4x1x256xf32, #tpu.memory_space<any>>
    %c0_i32_34 = arith.constant 0 : i32
    %c3_i32_35 = arith.constant 3 : i32
    %c0_i32_36 = arith.constant 0 : i32
    %53 = tpu.memref_slice %arg3[%c0_i32_34, %c3_i32_35, %c0_i32_36] : memref<4x8x256xf32, #tpu.memory_space<vmem>> -> memref<4x1x256xf32, #tpu.memory_space<vmem>>
    %54 = tpu.memref_slice %arg4[%c3_i32_31] : memref<8x!tpu.dma_semaphore, #tpu.memory_space<semaphore_mem>> -> memref<1x!tpu.dma_semaphore, #tpu.memory_space<semaphore_mem>>
    %55 = tpu.memref_squeeze %54 : memref<1x!tpu.dma_semaphore, #tpu.memory_space<semaphore_mem>> -> memref<!tpu.dma_semaphore, #tpu.memory_space<semaphore_mem>>
    tpu.enqueue_dma source(%52 : memref<4x1x256xf32, #tpu.memory_space<any>>) target(%53 : memref<4x1x256xf32, #tpu.memory_space<vmem>>) target_semaphore(%55 : memref<!tpu.dma_semaphore, #tpu.memory_space<semaphore_mem>>)
    %56 = arith.extui %21 : i1 to i32
    %c4_i32_37 = arith.constant 4 : i32
    %c0_i32_38 = arith.constant 0 : i32
    %57 = arith.cmpi ne, %56, %c0_i32_38 : i32
    scf.if %57 {
      %c0_i32_77 = arith.constant 0 : i32
      %c0_i32_78 = arith.constant 0 : i32
      %88 = tpu.memref_slice %arg2[%c0_i32_77, %20, %c0_i32_78] : memref<4x16x256xf32, #tpu.memory_space<any>> -> memref<4x1x256xf32, #tpu.memory_space<any>>
      %c0_i32_79 = arith.constant 0 : i32
      %c4_i32_80 = arith.constant 4 : i32
      %c0_i32_81 = arith.constant 0 : i32
      %89 = tpu.memref_slice %arg3[%c0_i32_79, %c4_i32_80, %c0_i32_81] : memref<4x8x256xf32, #tpu.memory_space<vmem>> -> memref<4x1x256xf32, #tpu.memory_space<vmem>>
      %90 = tpu.memref_slice %arg4[%c4_i32_37] : memref<8x!tpu.dma_semaphore, #tpu.memory_space<semaphore_mem>> -> memref<1x!tpu.dma_semaphore, #tpu.memory_space<semaphore_mem>>
      %91 = tpu.memref_squeeze %90 : memref<1x!tpu.dma_semaphore, #tpu.memory_space<semaphore_mem>> -> memref<!tpu.dma_semaphore, #tpu.memory_space<semaphore_mem>>
      tpu.enqueue_dma source(%88 : memref<4x1x256xf32, #tpu.memory_space<any>>) target(%89 : memref<4x1x256xf32, #tpu.memory_space<vmem>>) target_semaphore(%91 : memref<!tpu.dma_semaphore, #tpu.memory_space<semaphore_mem>>)
    } else {
    }
    %58 = arith.extui %27 : i1 to i32
    %c5_i32_39 = arith.constant 5 : i32
    %c0_i32_40 = arith.constant 0 : i32
    %59 = arith.cmpi ne, %58, %c0_i32_40 : i32
    scf.if %59 {
      %c0_i32_77 = arith.constant 0 : i32
      %c0_i32_78 = arith.constant 0 : i32
      %88 = tpu.memref_slice %arg2[%c0_i32_77, %26, %c0_i32_78] : memref<4x16x256xf32, #tpu.memory_space<any>> -> memref<4x1x256xf32, #tpu.memory_space<any>>
      %c0_i32_79 = arith.constant 0 : i32
      %c5_i32_80 = arith.constant 5 : i32
      %c0_i32_81 = arith.constant 0 : i32
      %89 = tpu.memref_slice %arg3[%c0_i32_79, %c5_i32_80, %c0_i32_81] : memref<4x8x256xf32, #tpu.memory_space<vmem>> -> memref<4x1x256xf32, #tpu.memory_space<vmem>>
      %90 = tpu.memref_slice %arg4[%c5_i32_39] : memref<8x!tpu.dma_semaphore, #tpu.memory_space<semaphore_mem>> -> memref<1x!tpu.dma_semaphore, #tpu.memory_space<semaphore_mem>>
      %91 = tpu.memref_squeeze %90 : memref<1x!tpu.dma_semaphore, #tpu.memory_space<semaphore_mem>> -> memref<!tpu.dma_semaphore, #tpu.memory_space<semaphore_mem>>
      tpu.enqueue_dma source(%88 : memref<4x1x256xf32, #tpu.memory_space<any>>) target(%89 : memref<4x1x256xf32, #tpu.memory_space<vmem>>) target_semaphore(%91 : memref<!tpu.dma_semaphore, #tpu.memory_space<semaphore_mem>>)
    } else {
    }
    %60 = arith.extui %33 : i1 to i32
    %c6_i32_41 = arith.constant 6 : i32
    %c0_i32_42 = arith.constant 0 : i32
    %61 = arith.cmpi ne, %60, %c0_i32_42 : i32
    scf.if %61 {
      %c0_i32_77 = arith.constant 0 : i32
      %c0_i32_78 = arith.constant 0 : i32
      %88 = tpu.memref_slice %arg2[%c0_i32_77, %32, %c0_i32_78] : memref<4x16x256xf32, #tpu.memory_space<any>> -> memref<4x1x256xf32, #tpu.memory_space<any>>
      %c0_i32_79 = arith.constant 0 : i32
      %c6_i32_80 = arith.constant 6 : i32
      %c0_i32_81 = arith.constant 0 : i32
      %89 = tpu.memref_slice %arg3[%c0_i32_79, %c6_i32_80, %c0_i32_81] : memref<4x8x256xf32, #tpu.memory_space<vmem>> -> memref<4x1x256xf32, #tpu.memory_space<vmem>>
      %90 = tpu.memref_slice %arg4[%c6_i32_41] : memref<8x!tpu.dma_semaphore, #tpu.memory_space<semaphore_mem>> -> memref<1x!tpu.dma_semaphore, #tpu.memory_space<semaphore_mem>>
      %91 = tpu.memref_squeeze %90 : memref<1x!tpu.dma_semaphore, #tpu.memory_space<semaphore_mem>> -> memref<!tpu.dma_semaphore, #tpu.memory_space<semaphore_mem>>
      tpu.enqueue_dma source(%88 : memref<4x1x256xf32, #tpu.memory_space<any>>) target(%89 : memref<4x1x256xf32, #tpu.memory_space<vmem>>) target_semaphore(%91 : memref<!tpu.dma_semaphore, #tpu.memory_space<semaphore_mem>>)
    } else {
    }
    %62 = arith.extui %39 : i1 to i32
    %c7_i32_43 = arith.constant 7 : i32
    %c0_i32_44 = arith.constant 0 : i32
    %63 = arith.cmpi ne, %62, %c0_i32_44 : i32
    scf.if %63 {
      %c0_i32_77 = arith.constant 0 : i32
      %c0_i32_78 = arith.constant 0 : i32
      %88 = tpu.memref_slice %arg2[%c0_i32_77, %38, %c0_i32_78] : memref<4x16x256xf32, #tpu.memory_space<any>> -> memref<4x1x256xf32, #tpu.memory_space<any>>
      %c0_i32_79 = arith.constant 0 : i32
      %c7_i32_80 = arith.constant 7 : i32
      %c0_i32_81 = arith.constant 0 : i32
      %89 = tpu.memref_slice %arg3[%c0_i32_79, %c7_i32_80, %c0_i32_81] : memref<4x8x256xf32, #tpu.memory_space<vmem>> -> memref<4x1x256xf32, #tpu.memory_space<vmem>>
      %90 = tpu.memref_slice %arg4[%c7_i32_43] : memref<8x!tpu.dma_semaphore, #tpu.memory_space<semaphore_mem>> -> memref<1x!tpu.dma_semaphore, #tpu.memory_space<semaphore_mem>>
      %91 = tpu.memref_squeeze %90 : memref<1x!tpu.dma_semaphore, #tpu.memory_space<semaphore_mem>> -> memref<!tpu.dma_semaphore, #tpu.memory_space<semaphore_mem>>
      tpu.enqueue_dma source(%88 : memref<4x1x256xf32, #tpu.memory_space<any>>) target(%89 : memref<4x1x256xf32, #tpu.memory_space<vmem>>) target_semaphore(%91 : memref<!tpu.dma_semaphore, #tpu.memory_space<semaphore_mem>>)
    } else {
    }
    %c0_i32_45 = arith.constant 0 : i32
    %c0_i32_46 = arith.constant 0 : i32
    %c0_i32_47 = arith.constant 0 : i32
    %64 = tpu.memref_slice %arg2[%c0_i32_46, %3, %c0_i32_47] : memref<4x16x256xf32, #tpu.memory_space<any>> -> memref<4x1x256xf32, #tpu.memory_space<any>>
    %c0_i32_48 = arith.constant 0 : i32
    %c0_i32_49 = arith.constant 0 : i32
    %c0_i32_50 = arith.constant 0 : i32
    %65 = tpu.memref_slice %arg3[%c0_i32_48, %c0_i32_49, %c0_i32_50] : memref<4x8x256xf32, #tpu.memory_space<vmem>> -> memref<4x1x256xf32, #tpu.memory_space<vmem>>
    %66 = tpu.memref_slice %arg4[%c0_i32_45] : memref<8x!tpu.dma_semaphore, #tpu.memory_space<semaphore_mem>> -> memref<1x!tpu.dma_semaphore, #tpu.memory_space<semaphore_mem>>
    %67 = tpu.memref_squeeze %66 : memref<1x!tpu.dma_semaphore, #tpu.memory_space<semaphore_mem>> -> memref<!tpu.dma_semaphore, #tpu.memory_space<semaphore_mem>>
    tpu.wait_dma2 semaphore(%67 : memref<!tpu.dma_semaphore, #tpu.memory_space<semaphore_mem>>) src(%64 : memref<4x1x256xf32, #tpu.memory_space<any>>) dst(%65 : memref<4x1x256xf32, #tpu.memory_space<vmem>>)
    %c1_i32_51 = arith.constant 1 : i32
    %c0_i32_52 = arith.constant 0 : i32
    %c0_i32_53 = arith.constant 0 : i32
    %68 = tpu.memref_slice %arg2[%c0_i32_52, %7, %c0_i32_53] : memref<4x16x256xf32, #tpu.memory_space<any>> -> memref<4x1x256xf32, #tpu.memory_space<any>>
    %c0_i32_54 = arith.constant 0 : i32
    %c1_i32_55 = arith.constant 1 : i32
    %c0_i32_56 = arith.constant 0 : i32
    %69 = tpu.memref_slice %arg3[%c0_i32_54, %c1_i32_55, %c0_i32_56] : memref<4x8x256xf32, #tpu.memory_space<vmem>> -> memref<4x1x256xf32, #tpu.memory_space<vmem>>
    %70 = tpu.memref_slice %arg4[%c1_i32_51] : memref<8x!tpu.dma_semaphore, #tpu.memory_space<semaphore_mem>> -> memref<1x!tpu.dma_semaphore, #tpu.memory_space<semaphore_mem>>
    %71 = tpu.memref_squeeze %70 : memref<1x!tpu.dma_semaphore, #tpu.memory_space<semaphore_mem>> -> memref<!tpu.dma_semaphore, #tpu.memory_space<semaphore_mem>>
    tpu.wait_dma2 semaphore(%71 : memref<!tpu.dma_semaphore, #tpu.memory_space<semaphore_mem>>) src(%68 : memref<4x1x256xf32, #tpu.memory_space<any>>) dst(%69 : memref<4x1x256xf32, #tpu.memory_space<vmem>>)
    %c2_i32_57 = arith.constant 2 : i32
    %c0_i32_58 = arith.constant 0 : i32
    %c0_i32_59 = arith.constant 0 : i32
    %72 = tpu.memref_slice %arg2[%c0_i32_58, %11, %c0_i32_59] : memref<4x16x256xf32, #tpu.memory_space<any>> -> memref<4x1x256xf32, #tpu.memory_space<any>>
    %c0_i32_60 = arith.constant 0 : i32
    %c2_i32_61 = arith.constant 2 : i32
    %c0_i32_62 = arith.constant 0 : i32
    %73 = tpu.memref_slice %arg3[%c0_i32_60, %c2_i32_61, %c0_i32_62] : memref<4x8x256xf32, #tpu.memory_space<vmem>> -> memref<4x1x256xf32, #tpu.memory_space<vmem>>
    %74 = tpu.memref_slice %arg4[%c2_i32_57] : memref<8x!tpu.dma_semaphore, #tpu.memory_space<semaphore_mem>> -> memref<1x!tpu.dma_semaphore, #tpu.memory_space<semaphore_mem>>
    %75 = tpu.memref_squeeze %74 : memref<1x!tpu.dma_semaphore, #tpu.memory_space<semaphore_mem>> -> memref<!tpu.dma_semaphore, #tpu.memory_space<semaphore_mem>>
    tpu.wait_dma2 semaphore(%75 : memref<!tpu.dma_semaphore, #tpu.memory_space<semaphore_mem>>) src(%72 : memref<4x1x256xf32, #tpu.memory_space<any>>) dst(%73 : memref<4x1x256xf32, #tpu.memory_space<vmem>>)
    %c3_i32_63 = arith.constant 3 : i32
    %c0_i32_64 = arith.constant 0 : i32
    %c0_i32_65 = arith.constant 0 : i32
    %76 = tpu.memref_slice %arg2[%c0_i32_64, %15, %c0_i32_65] : memref<4x16x256xf32, #tpu.memory_space<any>> -> memref<4x1x256xf32, #tpu.memory_space<any>>
    %c0_i32_66 = arith.constant 0 : i32
    %c3_i32_67 = arith.constant 3 : i32
    %c0_i32_68 = arith.constant 0 : i32
    %77 = tpu.memref_slice %arg3[%c0_i32_66, %c3_i32_67, %c0_i32_68] : memref<4x8x256xf32, #tpu.memory_space<vmem>> -> memref<4x1x256xf32, #tpu.memory_space<vmem>>
    %78 = tpu.memref_slice %arg4[%c3_i32_63] : memref<8x!tpu.dma_semaphore, #tpu.memory_space<semaphore_mem>> -> memref<1x!tpu.dma_semaphore, #tpu.memory_space<semaphore_mem>>
    %79 = tpu.memref_squeeze %78 : memref<1x!tpu.dma_semaphore, #tpu.memory_space<semaphore_mem>> -> memref<!tpu.dma_semaphore, #tpu.memory_space<semaphore_mem>>
    tpu.wait_dma2 semaphore(%79 : memref<!tpu.dma_semaphore, #tpu.memory_space<semaphore_mem>>) src(%76 : memref<4x1x256xf32, #tpu.memory_space<any>>) dst(%77 : memref<4x1x256xf32, #tpu.memory_space<vmem>>)
    %80 = arith.extui %21 : i1 to i32
    %c4_i32_69 = arith.constant 4 : i32
    %c0_i32_70 = arith.constant 0 : i32
    %81 = arith.cmpi ne, %80, %c0_i32_70 : i32
    scf.if %81 {
      %c0_i32_77 = arith.constant 0 : i32
      %c0_i32_78 = arith.constant 0 : i32
      %88 = tpu.memref_slice %arg2[%c0_i32_77, %20, %c0_i32_78] : memref<4x16x256xf32, #tpu.memory_space<any>> -> memref<4x1x256xf32, #tpu.memory_space<any>>
      %c0_i32_79 = arith.constant 0 : i32
      %c4_i32_80 = arith.constant 4 : i32
      %c0_i32_81 = arith.constant 0 : i32
      %89 = tpu.memref_slice %arg3[%c0_i32_79, %c4_i32_80, %c0_i32_81] : memref<4x8x256xf32, #tpu.memory_space<vmem>> -> memref<4x1x256xf32, #tpu.memory_space<vmem>>
      %90 = tpu.memref_slice %arg4[%c4_i32_69] : memref<8x!tpu.dma_semaphore, #tpu.memory_space<semaphore_mem>> -> memref<1x!tpu.dma_semaphore, #tpu.memory_space<semaphore_mem>>
      %91 = tpu.memref_squeeze %90 : memref<1x!tpu.dma_semaphore, #tpu.memory_space<semaphore_mem>> -> memref<!tpu.dma_semaphore, #tpu.memory_space<semaphore_mem>>
      tpu.wait_dma2 semaphore(%91 : memref<!tpu.dma_semaphore, #tpu.memory_space<semaphore_mem>>) src(%88 : memref<4x1x256xf32, #tpu.memory_space<any>>) dst(%89 : memref<4x1x256xf32, #tpu.memory_space<vmem>>)
    } else {
    }
    %82 = arith.extui %27 : i1 to i32
    %c5_i32_71 = arith.constant 5 : i32
    %c0_i32_72 = arith.constant 0 : i32
    %83 = arith.cmpi ne, %82, %c0_i32_72 : i32
    scf.if %83 {
      %c0_i32_77 = arith.constant 0 : i32
      %c0_i32_78 = arith.constant 0 : i32
      %88 = tpu.memref_slice %arg2[%c0_i32_77, %26, %c0_i32_78] : memref<4x16x256xf32, #tpu.memory_space<any>> -> memref<4x1x256xf32, #tpu.memory_space<any>>
      %c0_i32_79 = arith.constant 0 : i32
      %c5_i32_80 = arith.constant 5 : i32
      %c0_i32_81 = arith.constant 0 : i32
      %89 = tpu.memref_slice %arg3[%c0_i32_79, %c5_i32_80, %c0_i32_81] : memref<4x8x256xf32, #tpu.memory_space<vmem>> -> memref<4x1x256xf32, #tpu.memory_space<vmem>>
      %90 = tpu.memref_slice %arg4[%c5_i32_71] : memref<8x!tpu.dma_semaphore, #tpu.memory_space<semaphore_mem>> -> memref<1x!tpu.dma_semaphore, #tpu.memory_space<semaphore_mem>>
      %91 = tpu.memref_squeeze %90 : memref<1x!tpu.dma_semaphore, #tpu.memory_space<semaphore_mem>> -> memref<!tpu.dma_semaphore, #tpu.memory_space<semaphore_mem>>
      tpu.wait_dma2 semaphore(%91 : memref<!tpu.dma_semaphore, #tpu.memory_space<semaphore_mem>>) src(%88 : memref<4x1x256xf32, #tpu.memory_space<any>>) dst(%89 : memref<4x1x256xf32, #tpu.memory_space<vmem>>)
    } else {
    }
    %84 = arith.extui %33 : i1 to i32
    %c6_i32_73 = arith.constant 6 : i32
    %c0_i32_74 = arith.constant 0 : i32
    %85 = arith.cmpi ne, %84, %c0_i32_74 : i32
    scf.if %85 {
      %c0_i32_77 = arith.constant 0 : i32
      %c0_i32_78 = arith.constant 0 : i32
      %88 = tpu.memref_slice %arg2[%c0_i32_77, %32, %c0_i32_78] : memref<4x16x256xf32, #tpu.memory_space<any>> -> memref<4x1x256xf32, #tpu.memory_space<any>>
      %c0_i32_79 = arith.constant 0 : i32
      %c6_i32_80 = arith.constant 6 : i32
      %c0_i32_81 = arith.constant 0 : i32
      %89 = tpu.memref_slice %arg3[%c0_i32_79, %c6_i32_80, %c0_i32_81] : memref<4x8x256xf32, #tpu.memory_space<vmem>> -> memref<4x1x256xf32, #tpu.memory_space<vmem>>
      %90 = tpu.memref_slice %arg4[%c6_i32_73] : memref<8x!tpu.dma_semaphore, #tpu.memory_space<semaphore_mem>> -> memref<1x!tpu.dma_semaphore, #tpu.memory_space<semaphore_mem>>
      %91 = tpu.memref_squeeze %90 : memref<1x!tpu.dma_semaphore, #tpu.memory_space<semaphore_mem>> -> memref<!tpu.dma_semaphore, #tpu.memory_space<semaphore_mem>>
      tpu.wait_dma2 semaphore(%91 : memref<!tpu.dma_semaphore, #tpu.memory_space<semaphore_mem>>) src(%88 : memref<4x1x256xf32, #tpu.memory_space<any>>) dst(%89 : memref<4x1x256xf32, #tpu.memory_space<vmem>>)
    } else {
    }
    %86 = arith.extui %39 : i1 to i32
    %c7_i32_75 = arith.constant 7 : i32
    %c0_i32_76 = arith.constant 0 : i32
    %87 = arith.cmpi ne, %86, %c0_i32_76 : i32
    scf.if %87 {
      %c0_i32_77 = arith.constant 0 : i32
      %c0_i32_78 = arith.constant 0 : i32
      %88 = tpu.memref_slice %arg2[%c0_i32_77, %38, %c0_i32_78] : memref<4x16x256xf32, #tpu.memory_space<any>> -> memref<4x1x256xf32, #tpu.memory_space<any>>
      %c0_i32_79 = arith.constant 0 : i32
      %c7_i32_80 = arith.constant 7 : i32
      %c0_i32_81 = arith.constant 0 : i32
      %89 = tpu.memref_slice %arg3[%c0_i32_79, %c7_i32_80, %c0_i32_81] : memref<4x8x256xf32, #tpu.memory_space<vmem>> -> memref<4x1x256xf32, #tpu.memory_space<vmem>>
      %90 = tpu.memref_slice %arg4[%c7_i32_75] : memref<8x!tpu.dma_semaphore, #tpu.memory_space<semaphore_mem>> -> memref<1x!tpu.dma_semaphore, #tpu.memory_space<semaphore_mem>>
      %91 = tpu.memref_squeeze %90 : memref<1x!tpu.dma_semaphore, #tpu.memory_space<semaphore_mem>> -> memref<!tpu.dma_semaphore, #tpu.memory_space<semaphore_mem>>
      tpu.wait_dma2 semaphore(%91 : memref<!tpu.dma_semaphore, #tpu.memory_space<semaphore_mem>>) src(%88 : memref<4x1x256xf32, #tpu.memory_space<any>>) dst(%89 : memref<4x1x256xf32, #tpu.memory_space<vmem>>)
    } else {
    }
    return
  }
  func.func @transform_1(%arg0: i32, %arg1: memref<12xi32, #tpu.memory_space<smem>>) -> (i32, i32, i32) {
    %c0_i32 = arith.constant 0 : i32
    %c0_i32_0 = arith.constant 0 : i32
    %c0_i32_1 = arith.constant 0 : i32
    return %c0_i32, %arg0, %c0_i32_0 : i32, i32, i32
  }
}

</mosaic_0001>

<bundles_post_ra>
// kernel: tpu_custom_call.1
= control target key start
LH: loop header
LB: loop body
LE: loop exit
PB: predicated region body
PF: predicated region fallthrough
CT: control target
= control target key end

     0   :  { %s1104_s0 = inlined_call_operand.hbm [shape: s32[12], index: 0, kind: input, shape index: {}]   ;;  %s1105_s1 = inlined_call_operand.hbm [shape: f32[4,16,256], index: 1, kind: input, shape index: {}]   ;;  %s1106_s2 = inlined_call_operand.vmem [shape: f32[4,12,256], index: 2, kind: output, shape index: {}]  }
   0x1   :  { %1116 = sst [smem:[#allocation37_spill]] %s1106_s2  ;;  %s745_s11 = scalar_lea.hbm %s1104_s0, 16 }
   0x2   :  { %p746_p0 = scmp.ne.s32.totalorder %s1104_s0, %s745_s11  ;;  %p749_p1 = scmp.lt.u32.totalorder %s745_s11, %s1104_s0 }
   0x4   :  { %p751_p2 = pnand %p749_p1, %p746_p0 }
   0x6   :  { %754 = shalt.err (!%p751_p2)  }
   0x7   :  { %s797_s16 = smov [#allocation4]  }
   0x8   :  { %8 = dma.hbm_to_smem %s1104_s0, 16, %s797_s16, [#allocation3] }
   0x9   :  { %763 = dma.done.wait [#allocation3], 16 }
   0xa   :  { %764 = vsyncadd [#allocation3], 4294967280 }
   0xb   :  { %10 = sfence }
   0xc   :  { %s866_s19 = smov 0   ;;  %s868_s20 = smov 0  }
   0xd LB: > { %s875_s21 = sadd.s32 1, %s795_s20   ;;  %s22_s0 = sadd.s32 1, %s791_s19  ;;  %s795_s20 = sphi %s868_s20, %s1125_s20   ;;  %s791_s19 = sphi %s866_s19, %s1126_s19  }
   0xe   : > { %1117 = sst [smem:[#allocation35_spill]] %s875_s21  ;;  %s19_s22 = ssub.s32 %s795_s20, %s875_s21 }
   0xf   : > { %p26_p3 = scmp.eq.s32.totalorder %s795_s20, 1  ;;  %p20_p4 = scmp.eq.s32.totalorder %s19_s22, 0 }
  0x10   : > { %p577_p5 = scmp.ne.s32.totalorder %s19_s22, 0  ;;  %p578_p7 = scmp.ge.s32.totalorder %s795_s20, 2 }
  0x11   : > { %s880_s23 = scalar_select %p20_p4, %s791_s19, %s22_s0  }
  0x12   : > { %p882_p6 = por %p577_p5, %p26_p3  ;;  %41 = sbr.rel (%p578_p7) target bundleno = 170 (0xaa), region = 12 }
  0x13   : > { %1118 = sst [smem:[#allocation36_spill]] %s880_s23 }
  0x19   : > { %s45_s25 = sand.u32 1, %s791_s19   ;;  %s580_s26 = sshll.u32 %s795_s20, 3 }
  0x1a   : > { %s888_s27 = sshll.u32 %s45_s25, 6  ;;  %s49_s28 = sld [smem:[#allocation4 + %s580_s26]] }
  0x1b   : > { %s50_s29 = sadd.s32 1, %s580_s26  ;;  %s52_s3 = sadd.s32 2, %s580_s26 }
  0x1c   : > { %s890_s30 = sld [smem:[#allocation4 + %s50_s29]]  ;;  %s54_s5 = sadd.s32 3, %s580_s26 }
  0x1d   : > { %s892_s4 = sld [smem:[#allocation4 + %s52_s3]]  ;;  %s896_s7 = sadd.s32 4, %s580_s26 }
  0x1e   : > { %s894_s6 = sld [smem:[#allocation4 + %s54_s5]]  ;;  %p57_p8 = scmp.lt.s32.totalorder %s896_s7, 11 }
  0x1f   : > { %s899_s8 = sadd.s32 5, %s580_s26  ;;  %s902_s9 = sadd.s32 6, %s580_s26 }
  0x20   : > { %p62_p9 = scmp.lt.s32.totalorder %s899_s8, 11  ;;  %p67_p10 = scmp.lt.s32.totalorder %s902_s9, 11 }
  0x21   : > { %s58_s10 = scalar_select %p57_p8, %s896_s7, 11 }
  0x22   : > { %s63_s11 = scalar_select %p62_p9, %s899_s8, 11 }
  0x23   : > { %s906_s12 = sld [smem:[#allocation4 + %s58_s10]]  ;;  %s911_s14 = sadd.s32 7, %s580_s26 }
  0x24   : > { %s909_s13 = sld [smem:[#allocation4 + %s63_s11]]  ;;  %p72_p11 = scmp.lt.s32.totalorder %s911_s14, 11 }
  0x25   : > { %s68_s15 = scalar_select %p67_p10, %s902_s9, 11 }
  0x26   : > { %s76_s16 = sshrl.u32 %s49_s28, 3  ;;  %s77_s18 = sand.u32 7, %s49_s28  }
  0x27   : > { %s915_s17 = sld [smem:[#allocation4 + %s68_s15]]  ;;  %s581_s0 = sshll.u32 %s76_s16, 4 }
  0x28   : > { %s73_s19 = scalar_select %p72_p11, %s911_s14, 11 }
  0x29   : > { %s86_s22 = sld [smem:[#allocation0]]   ;;  %s79_s29 = sadd.s32 %s581_s0, %s77_s18 }
  0x2a   : > { %s918_s25 = sld [smem:[#allocation4 + %s73_s19]]  ;;  %s582_s3 = sshll.u32 %s79_s29, 4 }
  0x2b   : > { %s921_s5 = scalar_lea.vmem [#allocation5], %s888_s27  ;;  %s81_s23 = scalar_lea.hbm %s1105_s1, %s582_s3 }
  0x2c   : > { %s94_s26 = sshll.u32 %s921_s5, 4  ;;  %s1115_s21 = smov 512   ;;  %s95_s26 = int_to_ptr.vmem [resolvable:$true] %s94_s26 }
  0x2d   : > { %98 = sst [smem:[#allocation7]] %s1115_s21  ;;  %s1109_s15 = smov 256  }
  0x2e   : > { %100 = sst [smem:[#allocation7 + $0x1]] %s1109_s15  ;;  %s1111_s27 = smov 2  }
  0x2f   : > { %s583_s28 = sshll.u32 %s86_s22, 26  ;;  %102 = sst [smem:[#allocation7 + $0x2]] %s1111_s27 }
  0x30   : > { %s929_s16 = sadd.s32 134217728, %s583_s28  ;;  %s1113_s18 = smov 128  }
  0x31   : > { %104 = sst [smem:[#allocation7 + $0x3]] %s1113_s18  ;;  %s802_s19 = smov 1  }
  0x32   : > { %106 = sst [smem:[#allocation7 + $0x4]] %s1113_s18  ;;  %s803_s0 = smov [#allocation2]  }
  0x33   : > { %108 = sst [smem:[#allocation7 + $0x5]] %s802_s19  ;;  %s804_s22 = smov [#allocation6]  }
  0x34   : > { %110 = dma.general %s81_s23, 128, %s95_s26, %s803_s0, %s804_s22, [#allocation7], %s929_s16, 0  }
  0x35   : > { %134 = sst [smem:[#allocation9]] %s1115_s21  ;;  %p679_p12 = scmp.lt.s32.totalorder %s896_s7, 12 }
  0x36   : > { %136 = sst [smem:[#allocation9 + $0x1]] %s1109_s15  ;;  %s111_s29 = sshrl.u32 %s890_s30, 3 }
  0x37   : > { %138 = sst [smem:[#allocation9 + $0x2]] %s1111_s27  ;;  %s112_s3 = sand.u32 7, %s890_s30  }
  0x38   : > { %140 = sst [smem:[#allocation9 + $0x3]] %s1113_s18  ;;  %s585_s10 = sshll.u32 %s111_s29, 4 }
  0x39   : > { %142 = sst [smem:[#allocation9 + $0x4]] %s1113_s18  ;;  %s114_s11 = sadd.s32 %s585_s10, %s112_s3 }
  0x3a   : > { %144 = sst [smem:[#allocation9 + $0x5]] %s802_s19  ;;  %s586_s23 = sshll.u32 %s114_s11, 4 }
  0x3b   : > { %s116_s0 = scalar_lea.hbm %s1105_s1, %s586_s23  ;;  %s117_s22 = scalar_lea.vmem %s921_s5, 1 [#allocation5] }
  0x3c   : > { %s130_s15 = sshll.u32 %s117_s22, 4  ;;  %s805_s27 = smov [#allocation2 + $0x1]   ;;  %s131_s15 = int_to_ptr.vmem [resolvable:$true] %s130_s15 }
  0x3d   : > { %s806_s30 = smov [#allocation8]   ;;  %s147_s29 = sshrl.u32 %s892_s4, 3 }
  0x3e   : > { %146 = dma.general %s116_s0, 128, %s131_s15, %s805_s27, %s806_s30, [#allocation9], %s929_s16, 0  }
  0x3f   : > { %170 = sst [smem:[#allocation11]] %s1115_s21  ;;  %s1120_s18 = smov 256  }
  0x40   : > { %172 = sst [smem:[#allocation11 + $0x1]] %s1120_s18  ;;  %s148_s3 = sand.u32 7, %s892_s4  }
  0x41   : > { %s1121_s10 = smov 2   ;;  %s589_s11 = sshll.u32 %s147_s29, 4 }
  0x42   : > { %174 = sst [smem:[#allocation11 + $0x2]] %s1121_s10  ;;  %s1122_s23 = smov 128  }
  0x43   : > { %176 = sst [smem:[#allocation11 + $0x3]] %s1122_s23  ;;  %s150_s26 = sadd.s32 %s589_s11, %s148_s3 }
  0x44   : > { %178 = sst [smem:[#allocation11 + $0x4]] %s1122_s23  ;;  %s590_s28 = sshll.u32 %s150_s26, 4 }
  0x45   : > { %180 = sst [smem:[#allocation11 + $0x5]] %s802_s19  ;;  %s152_s0 = scalar_lea.hbm %s1105_s1, %s590_s28 }
  0x46   : > { %s153_s22 = scalar_lea.vmem %s921_s5, 2 [#allocation5]  ;;  %s183_s4 = sshrl.u32 %s894_s6, 3 }
  0x47   : > { %s166_s30 = sshll.u32 %s153_s22, 4  ;;  %s807_s21 = smov [#allocation2 + $0x2]   ;;  %s167_s30 = int_to_ptr.vmem [resolvable:$true] %s166_s30 }
  0x48   : > { %s808_s2 = smov [#allocation10]   ;;  %s1123_s29 = smov 512  }
  0x49   : > { %182 = dma.general %s152_s0, 128, %s167_s30, %s807_s21, %s808_s2, [#allocation11], %s929_s16, 0  }
  0x4a   : > { %206 = sst [smem:[#allocation13]] %s1123_s29  ;;  %s184_s3 = sand.u32 7, %s894_s6  }
  0x4b   : > { %208 = sst [smem:[#allocation13 + $0x1]] %s1120_s18  ;;  %s593_s11 = sshll.u32 %s183_s4, 4 }
  0x4c   : > { %210 = sst [smem:[#allocation13 + $0x2]] %s1121_s10  ;;  %s186_s26 = sadd.s32 %s593_s11, %s184_s3 }
  0x4d   : > { %212 = sst [smem:[#allocation13 + $0x3]] %s1122_s23  ;;  %s594_s28 = sshll.u32 %s186_s26, 4 }
  0x4e   : > { %214 = sst [smem:[#allocation13 + $0x4]] %s1122_s23  ;;  %s188_s22 = scalar_lea.hbm %s1105_s1, %s594_s28 }
  0x4f   : > { %216 = sst [smem:[#allocation13 + $0x5]] %s802_s19  ;;  %s189_s2 = scalar_lea.vmem %s921_s5, 3 [#allocation5] }
  0x50   : > { %s202_s21 = sshll.u32 %s189_s2, 4  ;;  %s809_s6 = smov [#allocation2 + $0x3]   ;;  %s203_s21 = int_to_ptr.vmem [resolvable:$true] %s202_s21 }
  0x51   : > { %s810_s18 = smov [#allocation12]  }
  0x52   : > { %218 = dma.general %s188_s22, 128, %s203_s21, %s809_s6, %s810_s18, [#allocation13], %s929_s16, 0  }
  0x53   : > { %s222_s10 = sshrl.u32 %s906_s12, 3  ;;  %s223_s23 = sand.u32 7, %s906_s12  }
  0x54   : > { %s598_s0 = sshll.u32 %s222_s10, 4  ;;  %s228_s30 = scalar_lea.vmem %s921_s5, 4 [#allocation5] }
  0x55   : > { %s225_s19 = sadd.s32 %s598_s0, %s223_s23  ;;  %s242_s4 = sshll.u32 %s228_s30, 4  ;;  %s243_s4 = int_to_ptr.vmem [resolvable:$true] %s242_s4 }
  0x56   : > { %s599_s29 = sshll.u32 %s225_s19, 4  ;;  %s811_s3 = smov 512  }
  0x57   : > { %s636_s16 = scalar_select %p679_p12, [#allocation0], [#allocation22] }
  0x58   : > { %637 = sst [smem:[#allocation15]] (%p679_p12), %s811_s3  ;;  %s812_s26 = smov 256  }
  0x59   : > { %s234_s11 = sld [smem:[%s636_s16]]   ;;  %s813_s12 = smov 2  }
  0x5a   : > { %638 = sst [smem:[#allocation15 + $0x1]] (%p679_p12), %s812_s26  ;;  %s227_s27 = scalar_lea.hbm %s1105_s1, %s599_s29 }
  0x5b   : > { %639 = sst [smem:[#allocation15 + $0x2]] (%p679_p12), %s813_s12  ;;  %s814_s22 = smov 128  }
  0x5c   : > { %640 = sst [smem:[#allocation15 + $0x3]] (%p679_p12), %s814_s22  ;;  %s815_s2 = smov 1  }
  0x5d   : > { %641 = sst [smem:[#allocation15 + $0x4]] (%p679_p12), %s814_s22  ;;  %s816_s18 = smov [#allocation2 + $0x4]  }
  0x5e   : > { %642 = sst [smem:[#allocation15 + $0x5]] (%p679_p12), %s815_s2  ;;  %s817_s10 = smov [#allocation14]  }
  0x5f   : > { %s600_s21 = sshll.u32 %s234_s11, 26  ;;  %p680_p13 = scmp.lt.s32.totalorder %s899_s8, 12 }
  0x60   : > { %s601_s6 = sadd.s32 134217728, %s600_s21 }
  0x61   : > { %643 = dma.general (%p679_p12), %s227_s27, 128, %s243_s4, %s816_s18, %s817_s10, [#allocation15], %s601_s6, 0  }
  0x62   : > { %s262_s23 = sshrl.u32 %s909_s13, 3  ;;  %s263_s0 = sand.u32 7, %s909_s13  }
  0x63   : > { %s603_s30 = sshll.u32 %s262_s23, 4  ;;  %s268_s19 = scalar_lea.vmem %s921_s5, 5 [#allocation5] }
  0x64   : > { %s265_s29 = sadd.s32 %s603_s30, %s263_s0  ;;  %s282_s16 = sshll.u32 %s268_s19, 4  ;;  %s283_s16 = int_to_ptr.vmem [resolvable:$true] %s282_s16 }
  0x65   : > { %s604_s3 = sshll.u32 %s265_s29, 4  ;;  %s818_s11 = smov 512  }
  0x66   : > { %s645_s4 = scalar_select %p680_p13, [#allocation0], [#allocation23] }
  0x67   : > { %646 = sst [smem:[#allocation17]] (%p680_p13), %s818_s11  ;;  %s819_s12 = smov 256  }
  0x68   : > { %s274_s26 = sld [smem:[%s645_s4]]   ;;  %s820_s13 = smov 2  }
  0x69   : > { %647 = sst [smem:[#allocation17 + $0x1]] (%p680_p13), %s819_s12  ;;  %s267_s27 = scalar_lea.hbm %s1105_s1, %s604_s3 }
  0x6a   : > { %648 = sst [smem:[#allocation17 + $0x2]] (%p680_p13), %s820_s13  ;;  %s821_s22 = smov 128  }
  0x6b   : > { %649 = sst [smem:[#allocation17 + $0x3]] (%p680_p13), %s821_s22  ;;  %s822_s2 = smov 1  }
  0x6c   : > { %650 = sst [smem:[#allocation17 + $0x4]] (%p680_p13), %s821_s22  ;;  %s823_s18 = smov [#allocation2 + $0x5]  }
  0x6d   : > { %651 = sst [smem:[#allocation17 + $0x5]] (%p680_p13), %s822_s2  ;;  %s824_s10 = smov [#allocation16]  }
  0x6e   : > { %s605_s21 = sshll.u32 %s274_s26, 26  ;;  %p681_p0 = scmp.lt.s32.totalorder %s902_s9, 12 }
  0x6f   : > { %s606_s6 = sadd.s32 134217728, %s605_s21 }
  0x70   : > { %652 = dma.general (%p680_p13), %s267_s27, 128, %s283_s16, %s823_s18, %s824_s10, [#allocation17], %s606_s6, 0  }
  0x71   : > { %s302_s23 = sshrl.u32 %s915_s17, 3  ;;  %s303_s0 = sand.u32 7, %s915_s17  }
  0x72   : > { %s608_s30 = sshll.u32 %s302_s23, 4  ;;  %s308_s19 = scalar_lea.vmem %s921_s5, 6 [#allocation5] }
  0x73   : > { %s305_s29 = sadd.s32 %s608_s30, %s303_s0  ;;  %s322_s3 = sshll.u32 %s308_s19, 4  ;;  %s323_s3 = int_to_ptr.vmem [resolvable:$true] %s322_s3 }
  0x74   : > { %s609_s4 = sshll.u32 %s305_s29, 4  ;;  %s825_s11 = smov 512  }
  0x75   : > { %s654_s16 = scalar_select %p681_p0, [#allocation0], [#allocation24] }
  0x76   : > { %655 = sst [smem:[#allocation19]] (%p681_p0), %s825_s11  ;;  %s826_s12 = smov 256  }
  0x77   : > { %s314_s26 = sld [smem:[%s654_s16]]   ;;  %s827_s17 = smov 2  }
  0x78   : > { %656 = sst [smem:[#allocation19 + $0x1]] (%p681_p0), %s826_s12  ;;  %s307_s15 = scalar_lea.hbm %s1105_s1, %s609_s4 }
  0x79   : > { %657 = sst [smem:[#allocation19 + $0x2]] (%p681_p0), %s827_s17  ;;  %s828_s27 = smov 128  }
  0x7a   : > { %658 = sst [smem:[#allocation19 + $0x3]] (%p681_p0), %s828_s27  ;;  %s829_s22 = smov 1  }
  0x7b   : > { %659 = sst [smem:[#allocation19 + $0x4]] (%p681_p0), %s828_s27  ;;  %s830_s6 = smov [#allocation2 + $0x6]  }
  0x7c   : > { %660 = sst [smem:[#allocation19 + $0x5]] (%p681_p0), %s829_s22  ;;  %s831_s18 = smov [#allocation18]  }
  0x7d   : > { %s610_s2 = sshll.u32 %s314_s26, 26  ;;  %p682_p1 = scmp.lt.s32.totalorder %s911_s14, 12 }
  0x7e   : > { %s611_s21 = sadd.s32 134217728, %s610_s2 }
  0x7f   : > { %661 = dma.general (%p681_p0), %s307_s15, 128, %s323_s3, %s830_s6, %s831_s18, [#allocation19], %s611_s21, 0  }
  0x80   : > { %s342_s10 = sshrl.u32 %s918_s25, 3  ;;  %s343_s23 = sand.u32 7, %s918_s25  }
  0x81   : > { %s613_s0 = sshll.u32 %s342_s10, 4  ;;  %s348_s30 = scalar_lea.vmem %s921_s5, 7 [#allocation5] }
  0x82   : > { %s345_s19 = sadd.s32 %s613_s0, %s343_s23  ;;  %s362_s29 = sshll.u32 %s348_s30, 4  ;;  %s363_s29 = int_to_ptr.vmem [resolvable:$true] %s362_s29 }
  0x83   : > { %s614_s4 = sshll.u32 %s345_s19, 4  ;;  %s832_s16 = smov 512  }
  0x84   : > { %s663_s3 = scalar_select %p682_p1, [#allocation0], [#allocation25] }
  0x85   : > { %664 = sst [smem:[#allocation21]] (%p682_p1), %s832_s16  ;;  %s833_s26 = smov 256  }
  0x86   : > { %s354_s11 = sld [smem:[%s663_s3]]   ;;  %s834_s25 = smov 2  }
  0x87   : > { %665 = sst [smem:[#allocation21 + $0x1]] (%p682_p1), %s833_s26  ;;  %s347_s13 = scalar_lea.hbm %s1105_s1, %s614_s4 }
  0x88   : > { %666 = sst [smem:[#allocation21 + $0x2]] (%p682_p1), %s834_s25  ;;  %s835_s28 = smov 128  }
  0x89   : > { %667 = sst [smem:[#allocation21 + $0x3]] (%p682_p1), %s835_s28  ;;  %s836_s15 = smov 1  }
  0x8a   : > { %668 = sst [smem:[#allocation21 + $0x4]] (%p682_p1), %s835_s28  ;;  %s837_s2 = smov [#allocation2 + $0x7]  }
  0x8b   : > { %669 = sst [smem:[#allocation21 + $0x5]] (%p682_p1), %s836_s15  ;;  %s838_s21 = smov [#allocation20]  }
  0x8c   : > { %s615_s27 = sshll.u32 %s354_s11, 26 }
  0x8d   : > { %s616_s22 = sadd.s32 134217728, %s615_s27 }
  0x8e   : > { %670 = dma.general (%p682_p1), %s347_s13, 128, %s363_s29, %s837_s2, %s838_s21, [#allocation21], %s616_s22, 0  }
  0x8f   : > { %765 = dma.done.wait [#allocation2], 128 }
  0x90   : > { %766 = vsyncadd [#allocation2], 4294967168 }
  0x91   : > { %767 = dma.done.wait [#allocation2 + $0x1], 128 }
  0x92   : > { %768 = vsyncadd [#allocation2 + $0x1], 4294967168 }
  0x93   : > { %769 = dma.done.wait [#allocation2 + $0x2], 128 }
  0x94   : > { %770 = vsyncadd [#allocation2 + $0x2], 4294967168 }
  0x95   : > { %771 = dma.done.wait [#allocation2 + $0x3], 128 }
  0x96   : > { %772 = vsyncadd [#allocation2 + $0x3], 4294967168 }
  0x97   : > { %774 = dma.done.wait (%p679_p12), [#allocation2 + $0x4], 128 }
  0x98   : > { %776 = vsyncadd (%p679_p12), [#allocation2 + $0x4], 4294967168 }
  0x99   : > { %778 = dma.done.wait (%p680_p13), [#allocation2 + $0x5], 128 }
  0x9a   : > { %780 = vsyncadd (%p680_p13), [#allocation2 + $0x5], 4294967168 }
  0x9b   : > { %782 = dma.done.wait (%p681_p0), [#allocation2 + $0x6], 128 }
  0x9c   : > { %784 = vsyncadd (%p681_p0), [#allocation2 + $0x6], 4294967168 }
  0x9d   : > { %786 = dma.done.wait (%p682_p1), [#allocation2 + $0x7], 128 }
  0x9e   : > { %788 = vsyncadd (%p682_p1), [#allocation2 + $0x7], 4294967168  ;;  %419 = sbr.rel (!%p882_p6) target bundleno = 170 (0xaa), region = 48 }
  0x9f   : > { %s634_s7 = sshll.u32 (%p882_p6), %s795_s20, 4  ;;  %v435_v0 = vld [vmem:[%s921_s5] sm:$0xff] (%p882_p6)  ;;  %v437_v1 = vld [vmem:[%s921_s5 + $0x8] sm:$0xff] (%p882_p6)  ;;  %v439_v2 = vld [vmem:[%s921_s5 + $0x10] sm:$0xff] (%p882_p6)  ;;  %s1124_s14 = sld [smem:[#allocation37_spill]] (%p882_p6) }
  0xa0   : > { %v441_v3 = vld [vmem:[%s921_s5 + $0x18] sm:$0xff] (%p882_p6)  ;;  %v443_v4 = vld [vmem:[%s921_s5 + $0x20] sm:$0xff] (%p882_p6)  ;;  %v445_v5 = vld [vmem:[%s921_s5 + $0x28] sm:$0xff] (%p882_p6) }
  0xa1   : > { %v447_v6 = vld [vmem:[%s921_s5 + $0x30] sm:$0xff] (%p882_p6)  ;;  %v449_v7 = vld [vmem:[%s921_s5 + $0x38] sm:$0xff] (%p882_p6) }
  0xa5   : > { %s422_s6 = scalar_lea.vmem %s1124_s14, %s634_s7 }
  0xa6   : > { %436 = vst [vmem:[%s422_s6] sm:$0xff] %v435_v0  ;;  %438 = vst [vmem:[%s422_s6 + $0x8] sm:$0xff] %v437_v1 }
  0xa7   : > { %440 = vst [vmem:[%s422_s6 + $0x20] sm:$0xff] %v439_v2  ;;  %442 = vst [vmem:[%s422_s6 + $0x28] sm:$0xff] %v441_v3 }
  0xa8   : > { %444 = vst [vmem:[%s422_s6 + $0x40] sm:$0xff] %v443_v4  ;;  %446 = vst [vmem:[%s422_s6 + $0x48] sm:$0xff] %v445_v5 }
  0xa9   : > { %448 = vst [vmem:[%s422_s6 + $0x60] sm:$0xff] %v447_v6  ;;  %450 = vst [vmem:[%s422_s6 + $0x68] sm:$0xff] %v449_v7 }
  0xaa PF: > { %s1125_s20 = sld [smem:[#allocation35_spill]]  ;;  %s1126_s19 = sld [smem:[#allocation36_spill]] }
  0xb0   : > { %p13_p2 = scmp.ge.s32.totalorder %s1125_s20, 3  }
  0xb2   :  { %15 = sbr.rel (!%p13_p2) target bundleno = 13 (0xd), region = 167 }
  0xb9   :  { %466 = vsyncmov [#allocation2] }
  0xbc   :  { %s467_s24 = vpop.sfrf %466 }
  0xbd   :  { %p626_p3 = scmp.ne.s32.totalorder %s467_s24, 0 }
  0xbf   :  { %471 = shalt.err (%p626_p3)  }
  0xc0   :  { %473 = vsyncmov [#allocation2 + $0x1] }
  0xc3   :  { %s474_s18 = vpop.sfrf %473 }
  0xc4   :  { %p627_p4 = scmp.ne.s32.totalorder %s474_s18, 0 }
  0xc6   :  { %478 = shalt.err (%p627_p4)  }
  0xc7   :  { %480 = vsyncmov [#allocation2 + $0x2] }
  0xca   :  { %s481_s5 = vpop.sfrf %480 }
  0xcb   :  { %p628_p5 = scmp.ne.s32.totalorder %s481_s5, 0 }
  0xcd   :  { %485 = shalt.err (%p628_p5)  }
  0xce   :  { %487 = vsyncmov [#allocation2 + $0x3] }
  0xd1   :  { %s488_s10 = vpop.sfrf %487 }
  0xd2   :  { %p629_p6 = scmp.ne.s32.totalorder %s488_s10, 0 }
  0xd4   :  { %492 = shalt.err (%p629_p6)  }
  0xd5   :  { %494 = vsyncmov [#allocation2 + $0x4] }
  0xd8   :  { %s495_s23 = vpop.sfrf %494 }
  0xd9   :  { %p630_p7 = scmp.ne.s32.totalorder %s495_s23, 0 }
  0xdb   :  { %499 = shalt.err (%p630_p7)  }
  0xdc   :  { %501 = vsyncmov [#allocation2 + $0x5] }
  0xdf   :  { %s502_s1 = vpop.sfrf %501 }
  0xe0   :  { %p631_p8 = scmp.ne.s32.totalorder %s502_s1, 0 }
  0xe2   :  { %506 = shalt.err (%p631_p8)  }
  0xe3   :  { %508 = vsyncmov [#allocation2 + $0x6] }
  0xe6   :  { %s509_s20 = vpop.sfrf %508 }
  0xe7   :  { %p632_p9 = scmp.ne.s32.totalorder %s509_s20, 0 }
  0xe9   :  { %513 = shalt.err (%p632_p9)  }
  0xea   :  { %515 = vsyncmov [#allocation2 + $0x7] }
  0xed   :  { %s516_s0 = vpop.sfrf %515 }
  0xee   :  { %p633_p10 = scmp.ne.s32.totalorder %s516_s0, 0 }
  0xf0   :  { %520 = shalt.err (%p633_p10)  }

</bundles_post_ra>
